<compile_context>
chip_gen: v6e
topology: v6e:2x2x1
jax: 0.10.0
libtpu: 0.0.40
codegen_flags: <defaults>
</compile_context>

<pallas_src>
import jax
import jax.numpy as jnp
from jax.experimental import pallas as pl
from jax.experimental.pallas import tpu as pltpu


_HEAD_PAD = 128          # lane-dense output width for the fused lc/dc heads
_BF16 = jnp.bfloat16
_VMEM = pl.BlockSpec(memory_space=pltpu.MemorySpace.VMEM)


# ----------------------------------------------------------------------------
# Fused Pallas kernel: pool -> bottleneck -> packed lc/dc stages -> fused head
# ----------------------------------------------------------------------------
def _dann_fused_kernel(x_ref, w1_ref, b1_ref, wa_ref, ba_ref,
                       wb_ref, bb_ref, wh_ref, bh_ref, o_ref):
    f32 = jnp.float32

    # AdaptiveAvgPool2d((1,1)) + Flatten: reduce the HW sublane axis,
    # channels stay lane-dense.
    x = x_ref[...].astype(f32)                                 # (Bp, HW, C)
    feat = jnp.mean(x, axis=1)                                 # (Bp, C)

    # bottleneck: Linear (eval BN folded into w1/b1) + ReLU
    z = jnp.dot(feat.astype(_BF16), w1_ref[...], preferred_element_type=f32)
    z = jnp.maximum(z + b1_ref[...], 0.0)                      # (Bp, f)

    # stage A: fused [lc1 | dc1(BN folded)] -> one lane-dense f->2h matmul
    a = jnp.dot(z.astype(_BF16), wa_ref[...], preferred_element_type=f32)
    a = jnp.maximum(a + ba_ref[...], 0.0)                      # (Bp, 2h) = [lc_h1 | dc_h]

    # stage B: block-diagonal [[lc2_w, 0], [0, I_h]]; ReLU on the identity
    # (dc) half is a no-op since that half is already >= 0.
    b = jnp.dot(a.astype(_BF16), wb_ref[...], preferred_element_type=f32)
    b = jnp.maximum(b + bb_ref[...], 0.0)                      # (Bp, 2h) = [lc_h2 | dc_h]

    # fused heads, zero-padded lane-dense: cols [0:n_out) <- lc3, [n_out:n_out+2) <- dc2
    out = jnp.dot(b.astype(_BF16), wh_ref[...], preferred_element_type=f32)
    o_ref[...] = (out + bh_ref[...]).astype(o_ref.dtype)       # (Bp, 128)


# ----------------------------------------------------------------------------
# Parameter construction (deterministic, in-script) + host-side folding
# ----------------------------------------------------------------------------
def _xavier_uniform(key, fan_in, fan_out):
    bound = jnp.sqrt(6.0 / (fan_in + fan_out))
    return jax.random.uniform(key, (fan_in, fan_out), jnp.float32, -bound, bound)


def _default_linear_init(key, fan_in, fan_out):
    # PyTorch default Linear init: U(-1/sqrt(fan_in), 1/sqrt(fan_in))
    bound = 1.0 / jnp.sqrt(float(fan_in))
    kw, kb = jax.random.split(key)
    w = jax.random.uniform(kw, (fan_in, fan_out), jnp.float32, -bound, bound)
    b = jax.random.uniform(kb, (fan_out,), jnp.float32, -bound, bound)
    return w, b


def make_dann_params(key, backbone_out_features, f, h, n_outputs):
    keys = jax.random.split(key, 6)
    p = {}
    # bottleneck: Linear(out_features, f) [xavier, bias 0.01], BN(f), ReLU
    p["bn_w"] = _xavier_uniform(keys[0], backbone_out_features, f)
    p["bn_b"] = jnp.full((f,), 0.01, jnp.float32)
    # lc: Linear(f,h) ReLU Dropout2d Linear(h,h) ReLU Linear(h,n_outputs)
    p["lc1_w"] = _xavier_uniform(keys[1], f, h)
    p["lc1_b"] = jnp.full((h,), 0.01, jnp.float32)
    p["lc2_w"] = _xavier_uniform(keys[2], h, h)
    p["lc2_b"] = jnp.full((h,), 0.01, jnp.float32)
    p["lc3_w"] = _xavier_uniform(keys[3], h, n_outputs)
    p["lc3_b"] = jnp.full((n_outputs,), 0.01, jnp.float32)
    # dc: Linear(f,h), BN(h), ReLU, Linear(h,2)   (default PyTorch init)
    p["dc1_w"], p["dc1_b"] = _default_linear_init(keys[4], f, h)
    p["dc2_w"], p["dc2_b"] = _default_linear_init(keys[5], h, 2)
    return p


def _fold_bn_eval(w, b, num_features, eps=1e-5):
    """Fold eval-mode BatchNorm1d (default running stats / affine) into Linear.

    TODO(synk): for a trained checkpoint the real running stats / gamma / beta
    must be folded in here instead of the fresh-init defaults.
    """
    gamma = jnp.ones((num_features,), jnp.float32)
    beta = jnp.zeros((num_features,), jnp.float32)
    running_mean = jnp.zeros((num_features,), jnp.float32)
    running_var = jnp.ones((num_features,), jnp.float32)
    scale = gamma / jnp.sqrt(running_var + eps)
    shift = beta - running_mean * scale
    return w * scale[None, :], b * scale + shift


def prepare_fused_params(params, f, h, n_outputs):
    """Host-side (one-time) BN folding, lane-dense weight packing, bf16 cast."""
    assert n_outputs + 2 <= _HEAD_PAD
    fp = {}

    # bottleneck: (C, f) weight, BN(eval) folded.  Biases stay f32.
    w1, b1 = _fold_bn_eval(params["bn_w"], params["bn_b"], f)
    fp["w1"] = w1.astype(_BF16)                                    # (C, f)
    fp["b1"] = b1.reshape(1, f)

    # stage A: [lc1 | dc1(BN folded)] -> (f, 2h)
    wdc1, bdc1 = _fold_bn_eval(params["dc1_w"], params["dc1_b"], h)
    fp["wa"] = jnp.concatenate([params["lc1_w"], wdc1], axis=1).astype(_BF16)
    fp["ba"] = jnp.concatenate([params["lc1_b"], bdc1], axis=0).reshape(1, 2 * h)

    # stage B: block-diagonal [[lc2_w, 0], [0, I_h]] -> (2h, 2h)
    wb = jnp.zeros((2 * h, 2 * h), jnp.float32)
    wb = wb.at[:h, :h].set(params["lc2_w"])
    wb = wb.at[h:, h:].set(jnp.eye(h, dtype=jnp.float32))
    fp["wb"] = wb.astype(_BF16)
    bb = jnp.zeros((2 * h,), jnp.float32).at[:h].set(params["lc2_b"])
    fp["bb"] = bb.reshape(1, 2 * h)

    # fused head: rows [0:h) (lc hidden) -> cols [0:n_out); rows [h:2h) (dc
    # hidden) -> cols [n_out:n_out+2); zero-padded to a lane-dense 128 width.
    wh = jnp.zeros((2 * h, _HEAD_PAD), jnp.float32)
    wh = wh.at[:h, :n_outputs].set(params["lc3_w"])
    wh = wh.at[h:, n_outputs:n_outputs + 2].set(params["dc2_w"])
    fp["wh"] = wh.astype(_BF16)
    bh = jnp.zeros((_HEAD_PAD,), jnp.float32)
    bh = bh.at[:n_outputs].set(params["lc3_b"])
    bh = bh.at[n_outputs:n_outputs + 2].set(params["dc2_b"])
    fp["bh"] = bh.reshape(1, _HEAD_PAD)
    return fp


# ----------------------------------------------------------------------------
# Dann forward (single pallas_call)
# ----------------------------------------------------------------------------
def _nbytes(a):
    return int(a.size) * int(a.dtype.itemsize)


def dann_forward(fused_params, x_nchw, alpha, n_outputs):
    del alpha  # gradient reversal is identity in the forward pass
    B, C, H, W = x_nchw.shape
    HW = H * W

    # Layout plumbing (wrapper-side): NCHW -> (B, HW, C) so channels are
    # lane-dense for the in-kernel pool + first matmul; cast input to bf16.
    x_bhwc = jnp.transpose(x_nchw, (0, 2, 3, 1)).reshape(B, HW, C).astype(_BF16)

    # Pad batch to a multiple of 8 sublanes; padded rows are sliced off below.
    Bp = ((B + 7) // 8) * 8
    if Bp != B:
        x_bhwc = jnp.pad(x_bhwc, ((0, Bp - B), (0, 0), (0, 0)))

    args = (
        x_bhwc,
        fused_params["w1"], fused_params["b1"],
        fused_params["wa"], fused_params["ba"],
        fused_params["wb"], fused_params["bb"],
        fused_params["wh"], fused_params["bh"],
    )

    # Scoped-VMEM limit sized to the actual resident bytes (covers v5e's
    # 16 MiB default and stays under v7x's 64 MiB physical VMEM).
    total_bytes = sum(_nbytes(a) for a in args) + Bp * _HEAD_PAD * 4
    vmem_limit = int(min(max(2 * total_bytes + (2 << 20), 4 << 20), 64 << 20))

    out = pl.pallas_call(
        _dann_fused_kernel,
        out_shape=jax.ShapeDtypeStruct((Bp, _HEAD_PAD), jnp.float32),
        in_specs=[_VMEM] * len(args),
        out_specs=_VMEM,
        compiler_params=pltpu.CompilerParams(vmem_limit_bytes=vmem_limit),
    )(*args)

    lc_logits = out[:B, :n_outputs]                 # x.view(B, -1)
    dc_logits = out[:B, n_outputs:n_outputs + 2]    # y.view(B, -1)
    return lc_logits, dc_logits


# ----------------------------------------------------------------------------
# Pure-JAX f32 reference (for a loose sanity check against bf16 kernel)
# ----------------------------------------------------------------------------
def dann_reference(params, x_nchw, f, h, n_outputs, eps=1e-5):
    feat = x_nchw.mean(axis=(2, 3))                                   # pool+flatten
    bn_scale = 1.0 / jnp.sqrt(1.0 + eps)
    z = jnp.maximum((feat @ params["bn_w"] + params["bn_b"]) * bn_scale, 0.0)
    lc = jnp.maximum(z @ params["lc1_w"] + params["lc1_b"], 0.0)
    lc = jnp.maximum(lc @ params["lc2_w"] + params["lc2_b"], 0.0)
    lc = lc @ params["lc3_w"] + params["lc3_b"]
    dc = jnp.maximum((z @ params["dc1_w"] + params["dc1_b"]) * bn_scale, 0.0)
    dc = dc @ params["dc2_w"] + params["dc2_b"]
    return lc, dc


# ----------------------------------------------------------------------------
if __name__ == "__main__":
    # Small synthetic shapes consistent with the module
    B, C_backbone, H, W = 2, 32, 8, 8   # backbone.out_features = 32
    F_DIM, H_DIM, N_OUT = 64, 64, 10    # f, h, n_outputs

    key = jax.random.PRNGKey(0)
    k_x, k_p = jax.random.split(key)
    x = jax.random.normal(k_x, (B, C_backbone, H, W), jnp.float32)
    alpha = 1.0

    params = make_dann_params(k_p, C_backbone, F_DIM, H_DIM, N_OUT)
    fused = prepare_fused_params(params, F_DIM, H_DIM, N_OUT)

    logits, domain = dann_forward(fused, x, alpha, N_OUT)
    jax.block_until_ready((logits, domain))

    assert logits.shape == (B, N_OUT), logits.shape
    assert domain.shape == (B, 2), domain.shape
    assert bool(jnp.all(jnp.isfinite(logits))) and bool(jnp.all(jnp.isfinite(domain)))

    # Loose numerical sanity check (bf16 kernel vs f32 reference).
    ref_lc, ref_dc = dann_reference(params, x, F_DIM, H_DIM, N_OUT)
    assert jnp.allclose(logits, ref_lc, rtol=2e-2, atol=2e-2)
    assert jnp.allclose(domain, ref_dc, rtol=2e-2, atol=2e-2)

    print("KERNEL_OK")
</pallas_src>

<mosaic_0001>
module attributes {stable_mosaic.version = 11 : i64} {
  func.func @_dann_fused_kernel(%arg0: memref<8x64x32xbf16, #tpu.memory_space<vmem>>, %arg1: memref<32x64xbf16, #tpu.memory_space<vmem>>, %arg2: memref<1x64xf32, #tpu.memory_space<vmem>>, %arg3: memref<64x128xbf16, #tpu.memory_space<vmem>>, %arg4: memref<1x128xf32, #tpu.memory_space<vmem>>, %arg5: memref<128x128xbf16, #tpu.memory_space<vmem>>, %arg6: memref<1x128xf32, #tpu.memory_space<vmem>>, %arg7: memref<128x128xbf16, #tpu.memory_space<vmem>>, %arg8: memref<1x128xf32, #tpu.memory_space<vmem>>, %arg9: memref<8x128xf32, #tpu.memory_space<vmem>>) attributes {dimension_semantics = [], scalar_prefetch = 0 : i64, scratch_operands = 0 : i64, tpu.core_type = #tpu.core_type<tc>} {
    %c0 = arith.constant 0 : index
    %c0_0 = arith.constant 0 : index
    %c0_1 = arith.constant 0 : index
    %0 = vector.load %arg0[%c0, %c0_0, %c0_1] : memref<8x64x32xbf16, #tpu.memory_space<vmem>>, vector<8x64x32xbf16>
    %1 = arith.extf %0 : vector<8x64x32xbf16> to vector<8x64x32xf32>
    %cst = arith.constant dense<0.000000e+00> : vector<8x32xf32>
    %2 = vector.multi_reduction <add>, %1, %cst [1] : vector<8x64x32xf32> to vector<8x32xf32>
    %cst_2 = arith.constant 6.400000e+01 : f32
    %3 = vector.broadcast %cst_2 : f32 to vector<8x32xf32>
    %4 = arith.divf %2, %3 : vector<8x32xf32>
    %5 = arith.truncf %4 : vector<8x32xf32> to vector<8x32xbf16>
    %c0_3 = arith.constant 0 : index
    %c0_4 = arith.constant 0 : index
    %6 = vector.load %arg1[%c0_3, %c0_4] : memref<32x64xbf16, #tpu.memory_space<vmem>>, vector<32x64xbf16>
    %cst_5 = arith.constant dense<0.000000e+00> : vector<8x64xf32>
    %7 = tpu.matmul %5, %6, %cst_5 {dimension_numbers = #tpu.dot_dimension_numbers<[1], [0], [0], [1], [0, 0, 1, 1], [], []>} : vector<8x32xbf16>, vector<32x64xbf16>, vector<8x64xf32> -> vector<8x64xf32>
    %c0_6 = arith.constant 0 : index
    %c0_7 = arith.constant 0 : index
    %8 = vector.load %arg2[%c0_6, %c0_7] : memref<1x64xf32, #tpu.memory_space<vmem>>, vector<1x64xf32>
    %9 = vector.broadcast %8 : vector<1x64xf32> to vector<8x64xf32>
    %10 = arith.addf %7, %9 : vector<8x64xf32>
    %cst_8 = arith.constant 0.000000e+00 : f32
    %11 = vector.broadcast %cst_8 : f32 to vector<8x64xf32>
    %12 = arith.maximumf %10, %11 : vector<8x64xf32>
    %13 = arith.truncf %12 : vector<8x64xf32> to vector<8x64xbf16>
    %c0_9 = arith.constant 0 : index
    %c0_10 = arith.constant 0 : index
    %14 = vector.load %arg3[%c0_9, %c0_10] : memref<64x128xbf16, #tpu.memory_space<vmem>>, vector<64x128xbf16>
    %cst_11 = arith.constant dense<0.000000e+00> : vector<8x128xf32>
    %15 = tpu.matmul %13, %14, %cst_11 {dimension_numbers = #tpu.dot_dimension_numbers<[1], [0], [0], [1], [0, 0, 1, 1], [], []>} : vector<8x64xbf16>, vector<64x128xbf16>, vector<8x128xf32> -> vector<8x128xf32>
    %c0_12 = arith.constant 0 : index
    %c0_13 = arith.constant 0 : index
    %16 = vector.load %arg4[%c0_12, %c0_13] : memref<1x128xf32, #tpu.memory_space<vmem>>, vector<1x128xf32>
    %17 = vector.broadcast %16 : vector<1x128xf32> to vector<8x128xf32>
    %18 = arith.addf %15, %17 : vector<8x128xf32>
    %cst_14 = arith.constant 0.000000e+00 : f32
    %19 = vector.broadcast %cst_14 : f32 to vector<8x128xf32>
    %20 = arith.maximumf %18, %19 : vector<8x128xf32>
    %21 = arith.truncf %20 : vector<8x128xf32> to vector<8x128xbf16>
    %c0_15 = arith.constant 0 : index
    %c0_16 = arith.constant 0 : index
    %22 = vector.load %arg5[%c0_15, %c0_16] : memref<128x128xbf16, #tpu.memory_space<vmem>>, vector<128x128xbf16>
    %cst_17 = arith.constant dense<0.000000e+00> : vector<8x128xf32>
    %23 = tpu.matmul %21, %22, %cst_17 {dimension_numbers = #tpu.dot_dimension_numbers<[1], [0], [0], [1], [0, 0, 1, 1], [], []>} : vector<8x128xbf16>, vector<128x128xbf16>, vector<8x128xf32> -> vector<8x128xf32>
    %c0_18 = arith.constant 0 : index
    %c0_19 = arith.constant 0 : index
    %24 = vector.load %arg6[%c0_18, %c0_19] : memref<1x128xf32, #tpu.memory_space<vmem>>, vector<1x128xf32>
    %25 = vector.broadcast %24 : vector<1x128xf32> to vector<8x128xf32>
    %26 = arith.addf %23, %25 : vector<8x128xf32>
    %cst_20 = arith.constant 0.000000e+00 : f32
    %27 = vector.broadcast %cst_20 : f32 to vector<8x128xf32>
    %28 = arith.maximumf %26, %27 : vector<8x128xf32>
    %29 = arith.truncf %28 : vector<8x128xf32> to vector<8x128xbf16>
    %c0_21 = arith.constant 0 : index
    %c0_22 = arith.constant 0 : index
    %30 = vector.load %arg7[%c0_21, %c0_22] : memref<128x128xbf16, #tpu.memory_space<vmem>>, vector<128x128xbf16>
    %cst_23 = arith.constant dense<0.000000e+00> : vector<8x128xf32>
    %31 = tpu.matmul %29, %30, %cst_23 {dimension_numbers = #tpu.dot_dimension_numbers<[1], [0], [0], [1], [0, 0, 1, 1], [], []>} : vector<8x128xbf16>, vector<128x128xbf16>, vector<8x128xf32> -> vector<8x128xf32>
    %c0_24 = arith.constant 0 : index
    %c0_25 = arith.constant 0 : index
    %32 = vector.load %arg8[%c0_24, %c0_25] : memref<1x128xf32, #tpu.memory_space<vmem>>, vector<1x128xf32>
    %33 = vector.broadcast %32 : vector<1x128xf32> to vector<8x128xf32>
    %34 = arith.addf %31, %33 : vector<8x128xf32>
    %c0_26 = arith.constant 0 : index
    %c0_27 = arith.constant 0 : index
    %35 = vector.load %arg9[%c0_26, %c0_27] : memref<8x128xf32, #tpu.memory_space<vmem>>, vector<8x128xf32>
    tpu.vector_store %arg9[%c0_26, %c0_27], %34 {strides = array<i32>} : memref<8x128xf32, #tpu.memory_space<vmem>>, vector<8x128xf32>,
    return
  }
}

</mosaic_0001>

<bundles_post_ra>
// kernel: tpu_custom_call.1
= control target key start
LH: loop header
LB: loop body
LE: loop exit
PB: predicated region body
PF: predicated region fallthrough
CT: control target
= control target key end

     0   :  { %v1091_v1 = vmov 0.0   ;;  %vm1092_vm0 = vmmov 0   ;;  %vm162_vm1 = vcmask 261120   ;;  %s1670_s0 = inlined_call_operand.vmem [shape: bf16[8,64,32], index: 0, kind: input, shape index: {}]   ;;  %s1671_s1 = inlined_call_operand.vmem [shape: bf16[32,64], index: 1, kind: input, shape index: {}]   ;;  %s1672_s2 = inlined_call_operand.vmem [shape: f32[1,64], index: 2, kind: input, shape index: {}]   ;;  %s1673_s3 = inlined_call_operand.vmem [shape: bf16[64,128], index: 3, kind: input, shape index: {}]   ;;  %s1674_s4 = inlined_call_operand.vmem [shape: f32[1,128], index: 4, kind: input, shape index: {}]   ;;  %s1675_s5 = inlined_call_operand.vmem [shape: bf16[128,128], index: 5, kind: input, shape index: {}]   ;;  %s1676_s6 = inlined_call_operand.vmem [shape: f32[1,128], index: 6, kind: input, shape index: {}]   ;;  %s1677_s7 = inlined_call_operand.vmem [shape: bf16[128,128], index: 7, kind: input, shape index: {}]   ;;  %s1678_s8 = inlined_call_operand.vmem [shape: f32[1,128], index: 8, kind: input, shape index: {}]   ;;  %s1679_s9 = inlined_call_operand.hbm [shape: f32[8,128], index: 9, kind: output, shape index: {}]  }
   0x1   :  { %v1047_v0 = vld [vmem:[%s1671_s1 + $0x8] sm:$0xff]   ;;  %984 = vmatprep.subr.bf16.mxu0 %v1091_v1  ;;  %v1048_v2 = vld [vmem:[%s1671_s1] sm:$0xff]   ;;  %992 = vmatprep.subr.bf16.mxu1 %v1091_v1  ;;  %v1167_v5 = vld [vmem:[%s1670_s0 + $0x10] sm:$0xff]  }
   0x2   :  { %985 = vmatpush3.bf16.msra.mxu0 %v1047_v0  ;;  %988 = vmatprep.mubr.msk.bf16.mxu0 %vm1092_vm0, %v1091_v1  ;;  %v1157_v3 = vld [vmem:[%s1670_s0] sm:$0xff]   ;;  %v1162_v4 = vld [vmem:[%s1670_s0 + $0x8] sm:$0xff]   ;;  %v1173_v6 = vld [vmem:[%s1670_s0 + $0x18] sm:$0xff]   ;;  %v809_v15 = vunpack.c.l.bf16 %v1167_v5  ;;  %v810_v16 = vunpack.c.h.bf16 %v1167_v5 }
   0x3   :  { %986 = vmatprep.subr.bf16.mxu0 %v1091_v1  ;;  %v1178_v7 = vld [vmem:[%s1670_s0 + $0x20] sm:$0xff]   ;;  %v1183_v8 = vld [vmem:[%s1670_s0 + $0x28] sm:$0xff]   ;;  %1000 = vmatprep.mubr.msk.bf16.mxu1 %vm1092_vm0, %v1091_v1  ;;  %v801_v9 = vunpack.c.l.bf16 %v1157_v3  ;;  %v802_v10 = vunpack.c.h.bf16 %v1157_v3  ;;  %v805_v11 = vunpack.c.l.bf16 %v1162_v4  ;;  %v806_v12 = vunpack.c.h.bf16 %v1162_v4  ;;  %v1194_v13 = vld [vmem:[%s1670_s0 + $0x30] sm:$0xff]  }
   0x4   :  { %v1199_v14 = vld [vmem:[%s1670_s0 + $0x38] sm:$0xff]   ;;  %v813_v17 = vunpack.c.l.bf16 %v1173_v6  ;;  %v814_v18 = vunpack.c.h.bf16 %v1173_v6  ;;  %v1208_v19 = vld [vmem:[%s1670_s0 + $0x40] sm:$0xff]   ;;  %v1213_v20 = vld [vmem:[%s1670_s0 + $0x48] sm:$0xff]   ;;  %v817_v21 = vunpack.c.l.bf16 %v1178_v7  ;;  %v818_v22 = vunpack.c.h.bf16 %v1178_v7 }
   0x5   :  { %v821_v23 = vunpack.c.l.bf16 %v1183_v8  ;;  %v822_v24 = vunpack.c.h.bf16 %v1183_v8  ;;  %v1222_v25 = vld [vmem:[%s1670_s0 + $0x50] sm:$0xff]   ;;  %v1227_v26 = vld [vmem:[%s1670_s0 + $0x58] sm:$0xff]   ;;  %v825_v27 = vunpack.c.l.bf16 %v1194_v13  ;;  %v826_v28 = vunpack.c.h.bf16 %v1194_v13  ;;  %v1236_v31 = vld [vmem:[%s1670_s0 + $0x60] sm:$0xff]  }
   0x6   :  { %987 = vmatpush3.bf16.msra.mxu0 %v1048_v2  ;;  %v829_v29 = vunpack.c.l.bf16 %v1199_v14  ;;  %v830_v30 = vunpack.c.h.bf16 %v1199_v14  ;;  %v1241_v32 = vld [vmem:[%s1670_s0 + $0x68] sm:$0xff]   ;;  %v833_v33 = vunpack.c.l.bf16 %v1208_v19  ;;  %v834_v34 = vunpack.c.h.bf16 %v1208_v19  ;;  %v1251_v37 = vld [vmem:[%s1670_s0 + $0x70] sm:$0xff]   ;;  %v1256_v38 = vld [vmem:[%s1670_s0 + $0x78] sm:$0xff]  }
   0x7   :  { %1004 = vmatprep.subr.bf16.mxu0 %v1091_v1  ;;  %v837_v35 = vunpack.c.l.bf16 %v1213_v20  ;;  %v838_v36 = vunpack.c.h.bf16 %v1213_v20  ;;  %v1261_v39 = vld [vmem:[%s1670_s0 + $0x80] sm:$0xff]   ;;  %v841_v40 = vunpack.c.l.bf16 %v1222_v25  ;;  %v1270_v44 = vld [vmem:[%s1670_s0 + $0x88] sm:$0xff]   ;;  %v1275_v45 = vld [vmem:[%s1670_s0 + $0x90] sm:$0xff]   ;;  %v163_v55 = vsel %vm162_vm1, %v801_v9, 0.0 }
   0x8   :  { %v1280_v46 = vld [vmem:[%s1670_s0 + $0x98] sm:$0xff]   ;;  %v1289_v51 = vld [vmem:[%s1670_s0 + $0xa0] sm:$0xff]   ;;  %v1294_v52 = vld [vmem:[%s1670_s0 + $0xa8] sm:$0xff]   ;;  %v164_v41 = vsel %vm162_vm1, %v802_v10, 0.0  ;;  %v166_v47 = vsel %vm162_vm1, %v805_v11, 0.0  ;;  %v168_v42 = vsel %vm162_vm1, %v806_v12, 0.0  ;;  %v1681_v14 = vunpack.c.h.bf16 %v1236_v31 }
   0x9   :  { %v1299_v53 = vld [vmem:[%s1670_s0 + $0xb0] sm:$0xff]   ;;  %v1308_v58 = vld [vmem:[%s1670_s0 + $0xb8] sm:$0xff]   ;;  %v1313_v59 = vld [vmem:[%s1670_s0 + $0xc0] sm:$0xff]   ;;  %v165_v48 = vadd.f32 %v164_v41, %v163_v55  ;;  %v170_v3 = vsel %vm162_vm1, %v809_v15, 0.0  ;;  %v184_v9 = vsel %vm162_vm1, %v817_v21, 0.0  ;;  %v185_v10 = vsel %vm162_vm1, %v818_v22, 0.0 }
   0xa   :  { %v1318_v60 = vld [vmem:[%s1670_s0 + $0xc8] sm:$0xff]   ;;  %v1327_v2 = vld [vmem:[%s1670_s0 + $0xd0] sm:$0xff]   ;;  %v1332_v57 = vld [vmem:[%s1670_s0 + $0xd8] sm:$0xff]   ;;  %v187_v4 = vsel %vm162_vm1, %v821_v23, 0.0  ;;  %v172_v12 = vsel %vm162_vm1, %v810_v16, 0.0  ;;  %v174_v15 = vsel %vm162_vm1, %v813_v17, 0.0  ;;  %v186_v41 = vadd.f32 %v185_v10, %v184_v9 }
   0xb   :  { %v1341_v0 = vld [vmem:[%s1670_s0 + $0xe0] sm:$0xff]   ;;  %v1346_v61 = vld [vmem:[%s1670_s0 + $0xe8] sm:$0xff]   ;;  %v1049_v56 = vld [vmem:[%s1673_s3 + $0x18] sm:$0xff]   ;;  %v906_v62 = vunpack.c.h.bf16 %v1327_v2  ;;  %v167_v11 = vadd.f32 %v166_v47, %v165_v48  ;;  %v176_v7 = vsel %vm162_vm1, %v814_v18, 0.0  ;;  %v189_v21 = vsel %vm162_vm1, %v822_v24, 0.0 }
   0xc   :  { %v1358_v50 = vld [vmem:[%s1670_s0 + $0xf0] sm:$0xff]   ;;  %v1370_v54 = vld [vmem:[%s1670_s0 + $0xf8] sm:$0xff]   ;;  %993 = vmatpush3.bf16.msra.mxu1 %v1049_v56  ;;  %v913_v56 = vunpack.c.l.bf16 %v1341_v0  ;;  %v191_v22 = vsel %vm162_vm1, %v825_v27, 0.0  ;;  %v205_v5 = vsel %vm162_vm1, %v833_v33, 0.0  ;;  %v188_v23 = vadd.f32 %v187_v4, %v186_v41 }
   0xd   :  { %v1050_v43 = vld [vmem:[%s1673_s3 + $0x10] sm:$0xff]   ;;  %994 = vmatprep.subr.bf16.mxu1 %v1091_v1  ;;  %v922_v63 = vunpack.c.h.bf16 %v1358_v50  ;;  %v925_v49 = vunpack.c.l.bf16 %v1370_v54  ;;  %v169_v16 = vadd.f32 %v168_v42, %v167_v11  ;;  %v206_v6 = vsel %vm162_vm1, %v834_v34, 0.0 }
   0xe   :  { %v208_v8 = vsel %vm162_vm1, %v837_v35, 0.0  ;;  %v193_v17 = vsel %vm162_vm1, %v826_v28, 0.0  ;;  %v195_v18 = vsel %vm162_vm1, %v829_v29, 0.0  ;;  %v197_v24 = vsel %vm162_vm1, %v830_v30, 0.0 }
   0xf   :  { %v207_v27 = vadd.f32 %v206_v6, %v205_v5  ;;  %v171_v19 = vadd.f32 %v170_v3, %v169_v16  ;;  %v190_v33 = vadd.f32 %v189_v21, %v188_v23  ;;  %v210_v34 = vsel %vm162_vm1, %v838_v36, 0.0 }
  0x10   :  { %995 = vmatpush3.bf16.msra.mxu1 %v1050_v43  ;;  %v212_v13 = vsel %vm162_vm1, %v841_v40, 0.0  ;;  %v1680_v35 = vunpack.c.l.bf16 %v1236_v31  ;;  %v227_v30 = vsel %vm162_vm1, %v1681_v14, 0.0  ;;  %v1682_v42 = vunpack.c.l.bf16 %v1241_v32 }
  0x11   :  { %996 = vmatprep.subr.bf16.mxu1 %v1091_v1  ;;  %v209_v28 = vadd.f32 %v208_v8, %v207_v27  ;;  %v173_v20 = vadd.f32 %v172_v12, %v171_v19  ;;  %v192_v47 = vadd.f32 %v191_v22, %v190_v33  ;;  %v1683_v36 = vunpack.c.h.bf16 %v1222_v25 }
  0x12   :  { %v226_v29 = vsel %vm162_vm1, %v1680_v35, 0.0  ;;  %v229_v43 = vsel %vm162_vm1, %v1682_v42, 0.0  ;;  %v1684_v3 = vunpack.c.l.bf16 %v1227_v26  ;;  %v1685_v31 = vunpack.c.h.bf16 %v1227_v26 }
  0x13   :  { %v214_v48 = vsel %vm162_vm1, %v1683_v36, 0.0  ;;  %v228_v40 = vadd.f32 %v227_v30, %v226_v29  ;;  %v211_v55 = vadd.f32 %v210_v34, %v209_v28  ;;  %v1686_v4 = vunpack.c.h.bf16 %v1241_v32 }
  0x14   :  { %v216_v9 = vsel %vm162_vm1, %v1684_v3, 0.0  ;;  %v218_v10 = vsel %vm162_vm1, %v1685_v31, 0.0  ;;  %v175_v12 = vadd.f32 %v174_v15, %v173_v20  ;;  %v194_v41 = vadd.f32 %v193_v17, %v192_v47 }
  0x15   :  { %v231_v11 = vsel %vm162_vm1, %v1686_v4, 0.0  ;;  %v230_v21 = vadd.f32 %v229_v43, %v228_v40  ;;  %v1687_v25 = vunpack.c.l.bf16 %v1251_v37  ;;  %v213_v5 = vadd.f32 %v212_v13, %v211_v55 }
  0x16   :  { %v1688_v16 = vunpack.c.l.bf16 %v1261_v39  ;;  %v1689_v26 = vunpack.c.h.bf16 %v1261_v39  ;;  %v1690_v32 = vunpack.c.l.bf16 %v1270_v44  ;;  %v177_v15 = vadd.f32 %v176_v7, %v175_v12 }
  0x17   :  { %v233_v22 = vsel %vm162_vm1, %v1687_v25, 0.0  ;;  %v196_v17 = vadd.f32 %v195_v18, %v194_v41  ;;  %v232_v27 = vadd.f32 %v231_v11, %v230_v21  ;;  %v215_v33 = vadd.f32 %v214_v48, %v213_v5 }
  0x18   :  { %v247_v23 = vsel %vm162_vm1, %v1688_v16, 0.0  ;;  %v248_v6 = vsel %vm162_vm1, %v1689_v26, 0.0  ;;  %v250_v8 = vsel %vm162_vm1, %v1690_v32, 0.0  ;;  %v1691_v34 = vunpack.c.h.bf16 %v1251_v37 }
  0x19   :  { %v249_v19 = vadd.f32 %v248_v6, %v247_v23  ;;  %v1692_v28 = vunpack.c.l.bf16 %v1256_v38  ;;  %v1693_v39 = vunpack.c.h.bf16 %v1270_v44  ;;  %v178_v14 = vrot.slane %v177_v15, 4 }
  0x1a   :  { %v235_v13 = vsel %vm162_vm1, %v1691_v34, 0.0  ;;  %v198_v30 = vadd.f32 %v197_v24, %v196_v17  ;;  %v234_v42 = vadd.f32 %v233_v22, %v232_v27  ;;  %v217_v18 = vadd.f32 %v216_v9, %v215_v33 }
  0x1b   :  { %v237_v35 = vsel %vm162_vm1, %v1692_v28, 0.0  ;;  %v252_v29 = vsel %vm162_vm1, %v1693_v39, 0.0  ;;  %v251_v7 = vadd.f32 %v250_v8, %v249_v19  ;;  %v1694_v43 = vunpack.c.h.bf16 %v1256_v38 }
  0x1c   :  { %v1695_v37 = vunpack.c.l.bf16 %v1275_v45  ;;  %v1696_v36 = vunpack.c.l.bf16 %v1289_v51 }
  0x1d   :  { %v239_v20 = vsel %vm162_vm1, %v1694_v43, 0.0 }
  0x1e   :  { %v254_v47 = vsel %vm162_vm1, %v1695_v37, 0.0  ;;  %v268_v48 = vsel %vm162_vm1, %v1696_v36, 0.0 }
  0x1f   :  { %14 = vsyncpa [#allocation3], 0  ;;  %v179_v44 = vadd.f32 %v178_v14, %v177_v15  ;;  %v199_v40 = vrot.slane %v198_v30, 4  ;;  %v236_v55 = vadd.f32 %v235_v13, %v234_v42  ;;  %v253_v24 = vadd.f32 %v252_v29, %v251_v7  ;;  %s1093_s29 = smov [#allocation2]  }
  0x20   :  { %v219_v3 = vadd.f32 %v218_v10, %v217_v18  ;;  %v1697_v9 = vunpack.c.h.bf16 %v1275_v45  ;;  %v1698_v31 = vunpack.c.h.bf16 %v1289_v51  ;;  %v1699_v11 = vunpack.c.l.bf16 %v1294_v52  ;;  %s763_s30 = sshll.u32 %s1093_s29, 4  ;;  %s764_s30 = int_to_ptr.vmem [resolvable:$true] %s763_s30 }
  0x21   :  { %v180_v41 = vrot.slane %v179_v44, 2  ;;  %v200_v21 = vadd.f32 %v199_v40, %v198_v30  ;;  %v238_v25 = vadd.f32 %v237_v35, %v236_v55  ;;  %v255_v22 = vadd.f32 %v254_v47, %v253_v24  ;;  %p1074_p1 = scmp.lt.s32.totalorder %s764_s30, %s764_s30 }
  0x22   :  { %v256_v38 = vsel %vm162_vm1, %v1697_v9, 0.0  ;;  %v269_v4 = vsel %vm162_vm1, %v1698_v31, 0.0  ;;  %v271_v12 = vsel %vm162_vm1, %v1699_v11, 0.0  ;;  %v220_v5 = vrot.slane %v219_v3, 4 }
  0x23   :  { %v1700_v16 = vunpack.c.l.bf16 %v1280_v46  ;;  %v270_v45 = vadd.f32 %v269_v4, %v268_v48  ;;  %v1701_v23 = vunpack.c.h.bf16 %v1294_v52  ;;  %v181_v26 = vadd.f32 %v180_v41, %v179_v44 }
  0x24   :  { %v201_v6 = vrot.slane %v200_v21, 2  ;;  %v240_v32 = vadd.f32 %v239_v20, %v238_v25  ;;  %v257_v8 = vadd.f32 %v256_v38, %v255_v22  ;;  %v221_v15 = vadd.f32 %v220_v5, %v219_v3 }
  0x25   :  { %v258_v10 = vsel %vm162_vm1, %v1700_v16, 0.0  ;;  %v273_v51 = vsel %vm162_vm1, %v1701_v23, 0.0  ;;  %v1702_v17 = vunpack.c.h.bf16 %v1280_v46  ;;  %v272_v19 = vadd.f32 %v271_v12, %v270_v45 }
  0x26   :  { %v1703_v33 = vunpack.c.l.bf16 %v1299_v53  ;;  %v182_v13 = vrot.slane %v181_v26, 1  ;;  %v202_v28 = vadd.f32 %v201_v6, %v200_v21  ;;  %v241_v35 = vrot.slane %v240_v32, 4 }
  0x27   :  { %v260_v27 = vsel %vm162_vm1, %v1702_v17, 0.0  ;;  %v259_v52 = vadd.f32 %v258_v10, %v257_v8  ;;  %v222_v39 = vrot.slane %v221_v15, 2  ;;  %v274_v29 = vadd.f32 %v273_v51, %v272_v19 }
  0x28   :  { %v275_v34 = vsel %vm162_vm1, %v1703_v33, 0.0  ;;  %v1704_v14 = vunpack.c.l.bf16 %v1313_v59  ;;  %v1705_v42 = vunpack.c.h.bf16 %v1313_v59  ;;  %v203_v7 = vrot.slane %v202_v28, 1 }
  0x29   :  { %v242_v18 = vadd.f32 %v241_v35, %v240_v32  ;;  %v261_v43 = vadd.f32 %v260_v27, %v259_v52  ;;  %v1706_v20 = vunpack.c.h.bf16 %v1299_v53  ;;  %v223_v47 = vadd.f32 %v222_v39, %v221_v15 }
  0x2a   :  { %v289_v30 = vsel %vm162_vm1, %v1704_v14, 0.0  ;;  %v290_v46 = vsel %vm162_vm1, %v1705_v42, 0.0  ;;  %v276_v36 = vadd.f32 %v275_v34, %v274_v29  ;;  %v1707_v44 = vunpack.c.l.bf16 %v1318_v60 }
  0x2b   :  { %v277_v37 = vsel %vm162_vm1, %v1706_v20, 0.0  ;;  %v291_v48 = vadd.f32 %v290_v46, %v289_v30  ;;  %v243_v55 = vrot.slane %v242_v18, 2  ;;  %v262_v24 = vrot.slane %v261_v43, 4 }
  0x2c   :  { %v292_v40 = vsel %vm162_vm1, %v1707_v44, 0.0  ;;  %v1708_v59 = vunpack.c.l.bf16 %v1308_v58  ;;  %v1709_v9 = vunpack.c.h.bf16 %v1318_v60  ;;  %v183_v53 = vadd.f32 %v182_v13, %v181_v26 }
  0x2d   :  { %v278_v31 = vadd.f32 %v277_v37, %v276_v36  ;;  %v1710_v4 = vunpack.c.h.bf16 %v1308_v58  ;;  %v293_v12 = vadd.f32 %v292_v40, %v291_v48  ;;  %v224_v41 = vrot.slane %v223_v47, 1 }
  0x2e   :  { %v279_v3 = vsel %vm162_vm1, %v1708_v59, 0.0  ;;  %v294_v38 = vsel %vm162_vm1, %v1709_v9, 0.0  ;;  %v244_v21 = vadd.f32 %v243_v55, %v242_v18  ;;  %v263_v25 = vadd.f32 %v262_v24, %v261_v43 }
  0x2f   :  { %v281_v11 = vsel %vm162_vm1, %v1710_v4, 0.0  ;;  %v1711_v22 = vunpack.c.l.bf16 %v1327_v2  ;;  %v204_v16 = vadd.f32 %v203_v7, %v202_v28  ;;  %v280_v10 = vadd.f32 %v279_v3, %v278_v31 }
  0x30   :  { %v295_v45 = vadd.f32 %v294_v38, %v293_v12  ;;  %v298_v60 = vsel %vm162_vm1, %v906_v62, 0.0  ;;  %v245_v23 = vrot.slane %v244_v21, 1  ;;  %v264_v51 = vrot.slane %v263_v25, 2 }
  0x31   :  { %v296_v5 = vsel %vm162_vm1, %v1711_v22, 0.0  ;;  %v310_v58 = vsel %vm162_vm1, %v913_v56, 0.0  ;;  %v1712_v26 = vunpack.c.h.bf16 %v1341_v0  ;;  %v282_v32 = vadd.f32 %v281_v11, %v280_v10 }
  0x32   :  { %v297_v8 = vadd.f32 %v296_v5, %v295_v45  ;;  %v1713_v17 = vunpack.c.l.bf16 %v1346_v61  ;;  %v225_v2 = vadd.f32 %v224_v41, %v223_v47  ;;  %v265_v19 = vadd.f32 %v264_v51, %v263_v25 }
  0x33   :  { %v311_v6 = vsel %vm162_vm1, %v1712_v26, 0.0  ;;  %v1714_v62 = vunpack.c.l.bf16 %v1332_v57  ;;  %v1715_v34 = vunpack.c.h.bf16 %v1346_v61  ;;  %v283_v0 = vrot.slane %v282_v32, 4 }
  0x34   :  { %v312_v15 = vadd.f32 %v311_v6, %v310_v58  ;;  %v313_v27 = vsel %vm162_vm1, %v1713_v17, 0.0  ;;  %v299_v13 = vadd.f32 %v298_v60, %v297_v8  ;;  %v1716_v28 = vunpack.c.h.bf16 %v1332_v57 }
  0x35   :  { %v300_v33 = vsel %vm162_vm1, %v1714_v62, 0.0  ;;  %v315_v56 = vsel %vm162_vm1, %v1715_v34, 0.0  ;;  %v246_v39 = vadd.f32 %v245_v23, %v244_v21  ;;  %v266_v29 = vrot.slane %v265_v19, 1 }
  0x36   :  { %v302_v35 = vsel %vm162_vm1, %v1716_v28, 0.0  ;;  %v314_v52 = vadd.f32 %v313_v27, %v312_v15  ;;  %v1717_v14 = vunpack.c.l.bf16 %v1358_v50  ;;  %v332_v42 = vmul.f32 0.015625, %v183_v53 }
  0x37   :  { %v284_v46 = vadd.f32 %v283_v0, %v282_v32  ;;  %v301_v7 = vadd.f32 %v300_v33, %v299_v13  ;;  %v333_v61 = vmul.f32 0.015625, %v204_v16  ;;  %v926_v43 = vunpack.c.h.bf16 %v1370_v54 }
  0x38   :  { %v317_v30 = vsel %vm162_vm1, %v1717_v14, 0.0  ;;  %v316_v18 = vadd.f32 %v315_v56, %v314_v52  ;;  %v319_v57 = vsel %vm162_vm1, %v922_v63, 0.0  ;;  %v334_v20 = vmul.f32 0.015625, %v225_v2  ;;  %v1051_v14 = vld [vmem:[%s1673_s3 + $0x8] sm:$0xff]  }
  0x39   :  { %v340_v37 = vpack.c.bf16 %v332_v42, %v332_v42  ;;  %v285_v47 = vrot.slane %v284_v46, 2  ;;  %v303_v36 = vadd.f32 %v302_v35, %v301_v7  ;;  %v341_v44 = vpack.c.bf16 %v333_v61, %v333_v61  ;;  %997 = vmatpush3.bf16.msra.mxu1 %v1051_v14  ;;  %v1053_v42 = vld [vmem:[%s1675_s5 + $0x38] sm:$0xff]   ;;  %v1055_v7 = vld [vmem:[%s1675_s5 + $0x28] sm:$0xff]  }
  0x3a   :  { %v318_v48 = vadd.f32 %v317_v30, %v316_v18  ;;  %v267_v40 = vadd.f32 %v266_v29, %v265_v19  ;;  %v321_v55 = vsel %vm162_vm1, %v925_v49, 0.0  ;;  %v335_v9 = vmul.f32 0.015625, %v246_v39  ;;  %998 = vmatprep.subr.bf16.mxu1 %v1091_v1  ;;  %v1052_v30 = vld [vmem:[%s1673_s3] sm:$0xff]   ;;  %v1057_v61 = vld [vmem:[%s1675_s5 + $0x18] sm:$0xff]  }
  0x3b   :  { %v286_v24 = vadd.f32 %v285_v47, %v284_v46  ;;  %v304_v59 = vrot.slane %v303_v36, 4  ;;  %v323_v38 = vsel %vm162_vm1, %v926_v43, 0.0  ;;  %v342_v50 = vpack.c.bf16 %v334_v20, %v334_v20  ;;  %v1054_v46 = vld [vmem:[%s1675_s5 + $0x30] sm:$0xff]   ;;  %v1056_v18 = vld [vmem:[%s1675_s5 + $0x20] sm:$0xff]  }
  0x3c   :  { %v320_v3 = vadd.f32 %v319_v57, %v318_v48  ;;  %v367_v53 = vunpack.c.l.b16 %v340_v37  ;;  %v368_v11 = vunpack.c.l.b16 %v341_v44  ;;  %v336_v12 = vmul.f32 0.015625, %v267_v40  ;;  %v1058_v43 = vld [vmem:[%s1675_s5 + $0x10] sm:$0xff]   ;;  %v771_v57 = vld [vmem:[%s1672_s2] ss:$0 sm:$0xff] }
  0x3d   :  { %v287_v63 = vrot.slane %v286_v24, 1  ;;  %v305_v31 = vadd.f32 %v304_v59, %v303_v36  ;;  %vm375_vm2 = vcmask 1041409   ;;  %v343_v54 = vpack.c.bf16 %v335_v9, %v335_v9  ;;  %999 = vmatpush3.bf16.msra.mxu1 %v1052_v30  ;;  %v1061_v59 = vld [vmem:[%s1677_s7 + $0x38] sm:$0xff]   ;;  %v1063_v9 = vld [vmem:[%s1677_s7 + $0x28] sm:$0xff]  }
  0x3e   :  { %v322_v4 = vadd.f32 %v321_v55, %v320_v3  ;;  %v369_v22 = vunpack.c.l.b16 %v342_v50  ;;  %vm377_vm3 = vcmask 1042434   ;;  %v376_v10 = vsel %vm375_vm2, %v368_v11, %v367_v53  ;;  %1024 = vmatprep.subr.bf16.mxu1 %v1091_v1  ;;  %v1059_v55 = vld [vmem:[%s1675_s5 + $0x8] sm:$0xff]   ;;  %v1062_v3 = vld [vmem:[%s1677_s7 + $0x30] sm:$0xff]   ;;  %v1065_v50 = vld [vmem:[%s1677_s7 + $0x18] sm:$0xff]  }
  0x3f   :  { %v288_v41 = vadd.f32 %v287_v63, %v286_v24  ;;  %v306_v21 = vrot.slane %v305_v31, 2  ;;  %v344_v45 = vpack.c.bf16 %v336_v12, %v336_v12  ;;  %v370_v51 = vunpack.c.l.b16 %v343_v54  ;;  %v1060_v24 = vld [vmem:[%s1675_s5] sm:$0xff]   ;;  %v1066_v53 = vld [vmem:[%s1677_s7 + $0x10] sm:$0xff]   ;;  %v1067_v54 = vld [vmem:[%s1677_s7 + $0x8] sm:$0xff]  }
  0x40   :  { %v324_v25 = vadd.f32 %v323_v38, %v322_v4  ;;  %v378_v58 = vsel %vm377_vm3, %v369_v22, %v376_v10  ;;  %vm379_vm4 = vcmask 1043459   ;;  %vm381_vm5 = vcmask 1044484   ;;  %v1064_v38 = vld [vmem:[%s1677_s7 + $0x20] sm:$0xff]  }
  0x41   :  { %v307_v49 = vadd.f32 %v306_v21, %v305_v31  ;;  %v337_v16 = vmul.f32 0.015625, %v288_v41  ;;  %v371_v8 = vunpack.c.l.b16 %v344_v45  ;;  %v380_v27 = vsel %vm379_vm4, %v370_v51, %v378_v58  ;;  %v775_v63 = vld [vmem:[%s1674_s4] ss:$0 sm:$0xff] }
  0x42   :  { %v325_v5 = vrot.slane %v324_v25, 4  ;;  %vm383_vm6 = vcmask 1045509   ;;  %vm385_vm7 = vcmask 1046534   ;;  %vm387_vm8 = vcmask 1047559   ;;  %v1068_v22 = vld [vmem:[%s1677_s7] sm:$0xff]  }
  0x43   :  { %v308_v60 = vrot.slane %v307_v49, 1  ;;  %v345_v32 = vpack.c.bf16 %v337_v16, %v337_v16  ;;  %v382_v33 = vsel %vm381_vm5, %v371_v8, %v380_v27  ;;  %vm486_vm9 = vcmask 523264  }
  0x44   :  { %v326_v23 = vadd.f32 %v325_v5, %v324_v25 }
  0x45   :  { %v309_v26 = vadd.f32 %v308_v60, %v307_v49  ;;  %v372_v62 = vunpack.c.l.b16 %v345_v32  ;;  %v781_v49 = vld [vmem:[%s1676_s6] ss:$0 sm:$0xff]  ;;  %s1069_s6 = scalar_lea.vmem %s764_s30, 128 }
  0x46   :  { %v327_v6 = vrot.slane %v326_v23, 2  ;;  %p1070_p0 = scmp.ne.s32.totalorder %s764_s30, %s1069_s6  ;;  %p1075_p2 = scmp.lt.s32.totalorder %s1069_s6, %s1069_s6 }
  0x47   :  { %v338_v17 = vmul.f32 0.015625, %v309_v26  ;;  %v384_v13 = vsel %vm383_vm6, %v372_v62, %v382_v33 }
  0x48   :  { %v328_v15 = vadd.f32 %v327_v6, %v326_v23  ;;  %p1076_p3 = por %p1075_p2, %p1074_p1 }
  0x49   :  { %v346_v19 = vpack.c.bf16 %v338_v17, %v338_v17 }
  0x4a   :  { %v329_v2 = vrot.slane %v328_v15, 1  ;;  %p1077_p4 = pnand %p1076_p3, %p1070_p0 }
  0x4b   :  { %v373_v56 = vunpack.c.l.b16 %v346_v19 }
  0x4c   :  { %v330_v34 = vadd.f32 %v329_v2, %v328_v15 }
  0x4d   :  { %v386_v35 = vsel %vm385_vm7, %v373_v56, %v384_v13 }
  0x4e   :  { %v339_v0 = vmul.f32 0.015625, %v330_v34 }
  0x50   :  { %v347_v28 = vpack.c.bf16 %v339_v0, %v339_v0 }
  0x52   :  { %v374_v52 = vunpack.c.l.b16 %v347_v28 }
  0x54   :  { %v388_v39 = vsel %vm387_vm8, %v374_v52, %v386_v35 }
  0x55   :  { %v389_v29 = vpack.c.b16 %v388_v39, %v388_v39 }
  0x57   :  { %989 = vmatmul.mubr.msk.bf16.vlgmr.msra.gmra.mxu0 %vm162_vm1, %v389_v29 }
  0x58   :  { %1020 = vmatprep.mubr.msk.bf16.mxu0 %vm1092_vm0, %v1091_v1  ;;  %1005 = vmatpush3.bf16.msra.mxu0 %v1053_v42 }
  0x59   :  { %1006 = vmatprep.subr.bf16.mxu0 %v1091_v1 }
  0x5c   :  { %1007 = vmatpush3.bf16.msra.mxu0 %v1054_v46 }
  0x5d   :  { %1008 = vmatprep.subr.bf16.mxu0 %v1091_v1 }
  0x60   :  { %1009 = vmatpush3.bf16.msra.mxu0 %v1055_v7 }
  0x61   :  { %1010 = vmatprep.subr.bf16.mxu0 %v1091_v1 }
  0x64   :  { %1011 = vmatpush3.bf16.msra.mxu0 %v1056_v18 }
  0x65   :  { %1012 = vmatprep.subr.bf16.mxu0 %v1091_v1 }
  0x68   :  { %1013 = vmatpush3.bf16.msra.mxu0 %v1057_v61 }
  0x69   :  { %1014 = vmatprep.subr.bf16.mxu0 %v1091_v1 }
  0x6c   :  { %1015 = vmatpush3.bf16.msra.mxu0 %v1058_v43 }
  0x6d   :  { %1016 = vmatprep.subr.bf16.mxu0 %v1091_v1 }
  0x70   :  { %1017 = vmatpush3.bf16.msra.mxu0 %v1059_v55 }
  0x71   :  { %1018 = vmatprep.subr.bf16.mxu0 %v1091_v1 }
  0x74   :  { %1019 = vmatpush3.bf16.msra.mxu0 %v1060_v24 }
 0x117   :  { %v439_v20 = vpop.f32.mrf.mxu0 }
 0x118   :  { %v440_v37 = vadd.f32 %v771_v57, %v439_v20 }
 0x119   :  { %v990_v47 = vpop.f32.mrf.mxu0 }
 0x11a   :  { %v445_v36 = vmax.f32 %v440_v37, 0.0 }
 0x11b   :  { %v442_v48 = vpop.f32.mrf.mxu0 }
 0x11c   :  { %v446_v44 = vpack.c.bf16 %v445_v36, %v445_v36 }
 0x11d   :  { %v991_v40 = vpop.f32.mrf.mxu0 }
 0x11e   :  { %1001 = vmatmul.mubr.msk.bf16.vlgmr.msra.gmra.mxu1 %vm486_vm9, %v446_v44 }
 0x11f   :  { %1040 = vmatprep.mubr.msk.bf16.mxu1 %vm1092_vm0, %v1091_v1  ;;  %1025 = vmatpush3.bf16.msra.mxu1 %v1061_v59 }
 0x120   :  { %1026 = vmatprep.subr.bf16.mxu1 %v1091_v1 }
 0x123   :  { %1027 = vmatpush3.bf16.msra.mxu1 %v1062_v3 }
 0x124   :  { %1028 = vmatprep.subr.bf16.mxu1 %v1091_v1 }
 0x127   :  { %1029 = vmatpush3.bf16.msra.mxu1 %v1063_v9 }
 0x128   :  { %1030 = vmatprep.subr.bf16.mxu1 %v1091_v1 }
 0x12b   :  { %1031 = vmatpush3.bf16.msra.mxu1 %v1064_v38 }
 0x12c   :  { %1032 = vmatprep.subr.bf16.mxu1 %v1091_v1 }
 0x12f   :  { %1033 = vmatpush3.bf16.msra.mxu1 %v1065_v50 }
 0x130   :  { %1034 = vmatprep.subr.bf16.mxu1 %v1091_v1 }
 0x133   :  { %1035 = vmatpush3.bf16.msra.mxu1 %v1066_v53 }
 0x134   :  { %1036 = vmatprep.subr.bf16.mxu1 %v1091_v1 }
 0x137   :  { %1037 = vmatpush3.bf16.msra.mxu1 %v1067_v54 }
 0x138   :  { %1038 = vmatprep.subr.bf16.mxu1 %v1091_v1  ;;  %v790_v1 = vld [vmem:[%s1678_s8] ss:$0 sm:$0xff] }
 0x13b   :  { %1039 = vmatpush3.bf16.msra.mxu1 %v1068_v22 }
 0x1de   :  { %v524_v31 = vpop.f32.mrf.mxu1 }
 0x1df   :  { %v525_v4 = vadd.f32 %v775_v63, %v524_v31 }
 0x1e0   :  { %v1002_v11 = vpop.f32.mrf.mxu1 }
 0x1e1   :  { %v530_v12 = vmax.f32 %v525_v4, 0.0 }
 0x1e2   :  { %v527_v41 = vpop.f32.mrf.mxu1 }
 0x1e3   :  { %v531_v21 = vpack.c.bf16 %v530_v12, %v530_v12 }
 0x1e4   :  { %v1003_v25 = vpop.f32.mrf.mxu1 }
 0x1e5   :  { %1021 = vmatmul.mubr.bf16.vlgmr.msra.gmra.mxu0 %v531_v21 }
 0x2a5   :  { %v637_v5 = vpop.f32.mrf.mxu0 }
 0x2a6   :  { %v638_v16 = vadd.f32 %v781_v49, %v637_v5 }
 0x2a7   :  { %v1022_v10 = vpop.f32.mrf.mxu0 }
 0x2a8   :  { %v643_v45 = vmax.f32 %v638_v16, 0.0 }
 0x2a9   :  { %v640_v60 = vpop.f32.mrf.mxu0 }
 0x2aa   :  { %v644_v23 = vpack.c.bf16 %v643_v45, %v643_v45 }
 0x2ab   :  { %v1023_v51 = vpop.f32.mrf.mxu0 }
 0x2ac   :  { %1041 = vmatmul.mubr.bf16.vlgmr.msra.gmra.mxu1 %v644_v23 }
 0x36c   :  { %v750_v58 = vpop.f32.mrf.mxu1 }
 0x36d   :  { %v751_v26 = vadd.f32 %v790_v1, %v750_v58 }
 0x36e   :  { %v1042_v6 = vpop.f32.mrf.mxu1 }
 0x36f   :  { %756 = vst [vmem:[#allocation2] sm:$0xff] %v751_v26 }
 0x370   :  { %v753_v32 = vpop.f32.mrf.mxu1 }
 0x371   :  { %1080 = shalt.err (!%p1077_p4)
}
 0x372   :  { %766 = dma.vmem_to_hbm [thread:$0]  %s764_s30, 128, %s1679_s9, [#allocation3]   ;;  %v1043_v8 = vpop.f32.mrf.mxu1 }
 0x373   :  { %1089 = dma.done.wait [#allocation3], 128  }
 0x374   :  { %1090 = vsyncadd [#allocation3], 4294967168 }
 0x375   :  { %770 = vsyncpa [#allocation3], 1 }

</bundles_post_ra>
